<compile_context>
chip_gen: v7x
topology: tpu7x:2x2x1
jax: 0.10.0
libtpu: 0.0.40
codegen_flags: <defaults>
</compile_context>

<pallas_src>
import functools
import math

import jax
import jax.numpy as jnp
from jax.experimental import pallas as pl
from jax.experimental.pallas import tpu as pltpu


def _cross_attn_kernel(q_ref, k_ref, v_ref,
                       wq_ref, wk_ref, wv_ref, wo_ref, vec_ref,
                       *rest, num_heads, has_mask, mm_dtype):
    """One batch slab: slab-wide in-proj -> batch-fused per-head attention ->
    slab-wide out-proj -> residual -> LayerNorm -> one dense block store."""
    if has_mask:
        mask_ref, o_ref = rest
    else:
        (o_ref,) = rest
        mask_ref = None

    Bt, L, E = q_ref.shape
    S = k_ref.shape[1]
    H = num_heads
    Dh = E // H
    scale = 1.0 / math.sqrt(Dh)
    lower_mm = jnp.dtype(mm_dtype) != jnp.dtype(jnp.float32)

    # Loop-invariant parameter loads (hoisted once per grid step).
    wq = wq_ref[...]
    wk = wk_ref[...]
    wv = wv_ref[...]
    wo = wo_ref[...]
    vecs = vec_ref[...]                              # (6, E) f32
    bq, bk, bv, bo = (vecs[i:i + 1, :] for i in range(4))
    gamma, beta = vecs[4:5, :], vecs[5:6, :]
    mask = mask_ref[...] if has_mask else None       # (Bt*L, Bt*S) f32

    # Slab reshape: (Bt, L, E) -> (Bt*L, E).  Layout-preserving because either
    # Bt == 1 or L, S are multiples of the 8-sublane tile (enforced host-side).
    # Row r = b*L + l (batch-major).
    q_in = q_ref[...].reshape(Bt * L, E)
    k_in = k_ref[...].reshape(Bt * S, E)
    v_in = v_ref[...].reshape(Bt * S, E)

    # Slab-wide in-projections: one MXU matmul each, f32 accumulation.  PyTorch
    # scales q by 1/sqrt(Dh) after the (biased) in-projection.
    q = (jnp.dot(q_in.astype(mm_dtype), wq,
                 preferred_element_type=jnp.float32) + bq) * scale
    k = jnp.dot(k_in.astype(mm_dtype), wk, preferred_element_type=jnp.float32) + bk
    v = jnp.dot(v_in.astype(mm_dtype), wv, preferred_element_type=jnp.float32) + bv

    if lower_mm:
        qm, km, vm = q.astype(mm_dtype), k.astype(mm_dtype), v.astype(mm_dtype)
    else:
        qm, km, vm = q, k, v

    contract_last = (((1,), (1,)), ((), ()))   # A @ B^T without materializing B.T

    ctx_parts = []
    for h in range(H):                         # static loop over heads only
        cols = slice(h * Dh, (h + 1) * Dh)
        s = jax.lax.dot_general(qm[:, cols], km[:, cols], contract_last,
                                preferred_element_type=jnp.float32)  # (Bt*L, Bt*S)
        if has_mask:
            # Combined additive mask: user attn_mask + block-diagonal batch
            # separation (-1e30 on cross-batch score entries).
            s = s + mask
        s = s - jnp.max(s, axis=-1, keepdims=True)
        p = jnp.exp(s)
        p = p * pl.reciprocal(jnp.sum(p, axis=-1, keepdims=True), approx=True)
        ctx_parts.append(jnp.dot(p.astype(mm_dtype), vm[:, cols],
                                 preferred_element_type=jnp.float32))

    # Lane-dense assembly of per-head contexts: one concat in vregs, no Dh-wide
    # masked stores, no VMEM scratch.
    ctx = ctx_parts[0] if H == 1 else jnp.concatenate(ctx_parts, axis=-1)

    # Output projection (Dropout(p=0.1) in eval mode == identity).
    attn = jnp.dot(ctx.astype(mm_dtype), wo,
                   preferred_element_type=jnp.float32) + bo

    # Residual + LayerNorm(eps=1e-5, biased variance), slab-wide in f32.
    x = attn + q_in.astype(jnp.float32)
    mean = jnp.mean(x, axis=-1, keepdims=True)
    xc = x - mean
    var = jnp.mean(xc * xc, axis=-1, keepdims=True)
    y = xc * jax.lax.rsqrt(var + 1e-5) * gamma + beta

    # Single dense full-block store.
    o_ref[...] = y.reshape(Bt, L, E).astype(o_ref.dtype)


def _pick_batch_tile(n, l, s):
    """Batch-tile size.  Keep >= 2 grid steps when N allows (feeds both v7x
    TensorCores), require L/S sublane alignment for the free slab reshape when
    Bt > 1, and bound the block-diagonal score overhead / VMEM footprint."""
    if l % 8 or s % 8:
        return 1
    bt = 1
    for cand in (2, 4, 8):
        if n % cand == 0 and n // cand >= 2 and cand * max(l, s) <= 2048:
            bt = cand
    return bt


def cross_attention_layer(query, key, value, params, attn_mask=None,
                          matmul_dtype=None):
    """query: (L, N, E); key/value: (S, N, E) — PyTorch seq-first. Returns (L, N, E).

    matmul_dtype: optional lower-precision MXU operand dtype (e.g. jnp.bfloat16
    on v6e/v7x).  Softmax / accumulation / LayerNorm always stay in f32.
    Only 2-D (L, S) attn_mask (bool or additive float) is supported.
    """
    L, N, E = query.shape
    S = key.shape[0]
    H = params["num_heads"]
    assert E % H == 0, "embed_dim must be divisible by num_heads"

    mm_dtype = jnp.dtype(query.dtype if matmul_dtype is None else matmul_dtype)

    # Pre-transpose weights once host-side: kernel computes x @ W_t (== x @ W.T).
    w_in = params["in_proj_weight"]
    wq_t = w_in[0 * E:1 * E].T.astype(mm_dtype)
    wk_t = w_in[1 * E:2 * E].T.astype(mm_dtype)
    wv_t = w_in[2 * E:3 * E].T.astype(mm_dtype)
    wo_t = params["out_proj_weight"].T.astype(mm_dtype)

    # Pack all (E,) vectors into one (6, E) operand: bq, bk, bv, bo, gamma, beta.
    vecs = jnp.stack([
        params["in_proj_bias"][0 * E:1 * E],
        params["in_proj_bias"][1 * E:2 * E],
        params["in_proj_bias"][2 * E:3 * E],
        params["out_proj_bias"],
        params["ln_weight"],
        params["ln_bias"],
    ]).astype(jnp.float32)

    bt = _pick_batch_tile(N, L, S)
    assert N % bt == 0
    grid = (N // bt,)

    # Host-side batch-first relayout so every block is a contiguous slab and
    # all in-kernel work is dense 2-D (no strided per-batch extractions).
    q_bf = jnp.transpose(query, (1, 0, 2))
    k_bf = jnp.transpose(key, (1, 0, 2))
    v_bf = jnp.transpose(value, (1, 0, 2))

    act_q = lambda i: (i, 0, 0)
    act_kv = lambda i: (i, 0, 0)
    fixed2 = lambda i: (0, 0)

    in_specs = [
        pl.BlockSpec((bt, L, E), act_q),    # query slab
        pl.BlockSpec((bt, S, E), act_kv),   # key slab
        pl.BlockSpec((bt, S, E), act_kv),   # value slab
        pl.BlockSpec((E, E), fixed2),       # Wq^T   (grid-invariant)
        pl.BlockSpec((E, E), fixed2),       # Wk^T
        pl.BlockSpec((E, E), fixed2),       # Wv^T
        pl.BlockSpec((E, E), fixed2),       # Wo^T
        pl.BlockSpec((6, E), fixed2),       # packed biases + LN params
    ]
    args = [q_bf, k_bf, v_bf, wq_t, wk_t, wv_t, wo_t, vecs]

    # Combined additive mask: user attn_mask broadcast over the batch tile plus
    # a block-diagonal term separating batch elements in the fused slab.
    has_mask = (attn_mask is not None) or (bt > 1)
    if has_mask:
        if attn_mask is None:
            base = jnp.zeros((L, S), jnp.float32)
        elif attn_mask.dtype == jnp.bool_:
            # PyTorch bool mask: True == "not allowed to attend".
            # (A fully-masked row yields a uniform distribution, not NaN.)
            base = jnp.where(attn_mask, jnp.float32(-1e30), jnp.float32(0.0))
        else:
            base = attn_mask.astype(jnp.float32)
        if bt > 1:
            diag = jnp.where(jnp.eye(bt, dtype=bool), 0.0, -1e30).astype(jnp.float32)
            combined = (base[None, :, None, :] + diag[:, None, :, None]
                        ).reshape(bt * L, bt * S)
        else:
            combined = base
        in_specs.append(pl.BlockSpec((bt * L, bt * S), fixed2))
        args.append(combined)

    # Generation-aware VMEM budget: double-buffered blocks + f32 intermediates
    # + headroom, capped at 75% of physical VMEM (~48 MiB on v7x).
    isz = jnp.dtype(query.dtype).itemsize
    wsz = mm_dtype.itemsize
    block_bytes = (2 * bt * L * E + 2 * bt * S * E) * isz \
        + 4 * E * E * wsz + 6 * E * 4
    if has_mask:
        block_bytes += bt * L * bt * S * 4
    interm_bytes = (bt * (L + 2 * S) * E + 2 * bt * L * bt * S + 2 * bt * L * E) * 4
    needed = 2 * block_bytes + interm_bytes + (4 << 20)
    try:
        phys_vmem = pltpu.get_tpu_info().vmem_capacity_bytes
    except Exception:  # conservative fallback (v7x per-TC VMEM)
        phys_vmem = 64 << 20
    vmem_limit = int(min(max(needed, 32 << 20), int(phys_vmem * 0.75)))

    flops = 2 * N * E * E * (2 * L + 2 * S) + 4 * N * L * S * E
    cost = pl.CostEstimate(
        flops=int(flops),
        transcendentals=int(N * H * L * S),
        bytes_accessed=int((2 * L * N * E + 2 * S * N * E) * isz + 4 * E * E * wsz),
    )

    out_bf = pl.pallas_call(
        functools.partial(_cross_attn_kernel, num_heads=H, has_mask=has_mask,
                          mm_dtype=mm_dtype),
        out_shape=jax.ShapeDtypeStruct((N, L, E), query.dtype),
        grid_spec=pltpu.PrefetchScalarGridSpec(
            num_scalar_prefetch=0,
            grid=grid,
            in_specs=in_specs,
            out_specs=pl.BlockSpec((bt, L, E), act_q),
        ),
        compiler_params=pltpu.CompilerParams(
            dimension_semantics=("parallel",),
            vmem_limit_bytes=vmem_limit,
        ),
        cost_estimate=cost,
    )(*args)

    return jnp.transpose(out_bf, (1, 0, 2))


def _reference(query, key, value, params, attn_mask=None):
    """Pure-JAX reference mirroring PyTorch nn.MultiheadAttention + LayerNorm."""
    L, N, E = query.shape
    S = key.shape[0]
    H = params["num_heads"]
    Dh = E // H
    wq, wk, wv = (params["in_proj_weight"][i * E:(i + 1) * E] for i in range(3))
    bq, bk, bv = (params["in_proj_bias"][i * E:(i + 1) * E] for i in range(3))

    q = jnp.einsum("lne,fe->lnf", query, wq) + bq
    k = jnp.einsum("sne,fe->snf", key, wk) + bk
    v = jnp.einsum("sne,fe->snf", value, wv) + bv
    qh = q.reshape(L, N, H, Dh)
    kh = k.reshape(S, N, H, Dh)
    vh = v.reshape(S, N, H, Dh)
    s = jnp.einsum("lnhd,snhd->nhls", qh, kh) / (Dh ** 0.5)
    if attn_mask is not None:
        s = s + attn_mask[None, None]
    p = jax.nn.softmax(s, axis=-1)
    ctx = jnp.einsum("nhls,snhd->lnhd", p, vh).reshape(L, N, E)
    attn_out = jnp.einsum("lne,fe->lnf", ctx, params["out_proj_weight"]) + params["out_proj_bias"]
    x = attn_out + query
    mean = jnp.mean(x, axis=-1, keepdims=True)
    var = jnp.mean((x - mean) ** 2, axis=-1, keepdims=True)
    return (x - mean) / jnp.sqrt(var + 1e-5) * params["ln_weight"] + params["ln_bias"]


def init_params(embed_dim, num_heads, key):
    ks = jax.random.split(key, 4)
    scale = 0.05
    return {
        "num_heads": num_heads,
        "in_proj_weight": scale * jax.random.normal(ks[0], (3 * embed_dim, embed_dim), jnp.float32),
        "in_proj_bias": scale * jax.random.normal(ks[1], (3 * embed_dim,), jnp.float32),
        "out_proj_weight": scale * jax.random.normal(ks[2], (embed_dim, embed_dim), jnp.float32),
        "out_proj_bias": scale * jax.random.normal(ks[3], (embed_dim,), jnp.float32),
        "ln_weight": jnp.ones((embed_dim,), jnp.float32),
        "ln_bias": jnp.zeros((embed_dim,), jnp.float32),
    }


if __name__ == "__main__":
    L, S, N, E, H = 8, 8, 2, 32, 4   # target seq, source seq, batch, embed_dim, heads

    root = jax.random.PRNGKey(0)
    k_q, k_k, k_v, k_p, k_m, k_b = jax.random.split(root, 6)
    query = jax.random.normal(k_q, (L, N, E), jnp.float32)
    key = jax.random.normal(k_k, (S, N, E), jnp.float32)
    value = jax.random.normal(k_v, (S, N, E), jnp.float32)
    params = init_params(E, H, k_p)

    # No-mask path (mask operand fully elided; grid has 2 parallel steps).
    out = jax.block_until_ready(cross_attention_layer(query, key, value, params))
    ref = _reference(query, key, value, params)
    assert out.shape == (L, N, E)
    err = float(jnp.max(jnp.abs(out - ref)))
    assert err < 1e-3, f"no-mask max abs err {err}"

    # Additive float mask path.
    mask = 0.5 * jax.random.normal(k_m, (L, S), jnp.float32)
    out_m = jax.block_until_ready(
        cross_attention_layer(query, key, value, params, attn_mask=mask))
    ref_m = _reference(query, key, value, params, attn_mask=mask)
    err_m = float(jnp.max(jnp.abs(out_m - ref_m)))
    assert err_m < 1e-3, f"masked max abs err {err_m}"

    # Larger batch exercising the batch-fused (block-diagonal) attention path.
    N2 = 16
    q2 = jax.random.normal(k_b, (L, N2, E), jnp.float32)
    k2 = jax.random.normal(k_k, (S, N2, E), jnp.float32)
    v2 = jax.random.normal(k_v, (S, N2, E), jnp.float32)
    out2 = jax.block_until_ready(cross_attention_layer(q2, k2, v2, params))
    ref2 = _reference(q2, k2, v2, params)
    err2 = float(jnp.max(jnp.abs(out2 - ref2)))
    assert err2 < 1e-3, f"batch-fused max abs err {err2}"

    print("KERNEL_OK")
</pallas_src>

<mosaic_0001>
module attributes {stable_mosaic.version = 11 : i64} {
  func.func @_cross_attn_kernel(%arg0: i32, %arg1: memref<1x8x32xf32, #tpu.memory_space<vmem>>, %arg2: memref<1x8x32xf32, #tpu.memory_space<vmem>>, %arg3: memref<1x8x32xf32, #tpu.memory_space<vmem>>, %arg4: memref<32x32xf32, #tpu.memory_space<vmem>>, %arg5: memref<32x32xf32, #tpu.memory_space<vmem>>, %arg6: memref<32x32xf32, #tpu.memory_space<vmem>>, %arg7: memref<32x32xf32, #tpu.memory_space<vmem>>, %arg8: memref<6x32xf32, #tpu.memory_space<vmem>>, %arg9: memref<1x8x32xf32, #tpu.memory_space<vmem>>) attributes {dimension_semantics = [#tpu.dimension_semantics<parallel>], iteration_bounds = array<i64: 2>, scalar_prefetch = 0 : i64, scratch_operands = 0 : i64, tpu.core_type = #tpu.core_type<tc>, window_params = [{transform_indices = @transform_0, window_bounds = array<i64: 1, 8, 32>}, {transform_indices = @transform_1, window_bounds = array<i64: 1, 8, 32>}, {transform_indices = @transform_2, window_bounds = array<i64: 1, 8, 32>}, {pipeline_mode = #tpu.pipeline_mode<synchronous>, transform_indices = @transform_3, window_bounds = array<i64: 32, 32>}, {pipeline_mode = #tpu.pipeline_mode<synchronous>, transform_indices = @transform_4, window_bounds = array<i64: 32, 32>}, {pipeline_mode = #tpu.pipeline_mode<synchronous>, transform_indices = @transform_5, window_bounds = array<i64: 32, 32>}, {pipeline_mode = #tpu.pipeline_mode<synchronous>, transform_indices = @transform_6, window_bounds = array<i64: 32, 32>}, {pipeline_mode = #tpu.pipeline_mode<synchronous>, transform_indices = @transform_7, window_bounds = array<i64: 6, 32>}, {transform_indices = @transform_8, window_bounds = array<i64: 1, 8, 32>}]} {
    %c0 = arith.constant 0 : index
    %c0_0 = arith.constant 0 : index
    %0 = vector.load %arg4[%c0, %c0_0] : memref<32x32xf32, #tpu.memory_space<vmem>>, vector<32x32xf32>
    %c0_1 = arith.constant 0 : index
    %c0_2 = arith.constant 0 : index
    %1 = vector.load %arg5[%c0_1, %c0_2] : memref<32x32xf32, #tpu.memory_space<vmem>>, vector<32x32xf32>
    %c0_3 = arith.constant 0 : index
    %c0_4 = arith.constant 0 : index
    %2 = vector.load %arg6[%c0_3, %c0_4] : memref<32x32xf32, #tpu.memory_space<vmem>>, vector<32x32xf32>
    %c0_5 = arith.constant 0 : index
    %c0_6 = arith.constant 0 : index
    %3 = vector.load %arg7[%c0_5, %c0_6] : memref<32x32xf32, #tpu.memory_space<vmem>>, vector<32x32xf32>
    %c0_7 = arith.constant 0 : index
    %c0_8 = arith.constant 0 : index
    %4 = vector.load %arg8[%c0_7, %c0_8] : memref<6x32xf32, #tpu.memory_space<vmem>>, vector<6x32xf32>
    %5 = vector.extract_strided_slice %4 {offsets = [0, 0], sizes = [1, 32], strides = [1, 1]} : vector<6x32xf32> to vector<1x32xf32>
    %6 = vector.extract_strided_slice %4 {offsets = [1, 0], sizes = [1, 32], strides = [1, 1]} : vector<6x32xf32> to vector<1x32xf32>
    %7 = vector.extract_strided_slice %4 {offsets = [2, 0], sizes = [1, 32], strides = [1, 1]} : vector<6x32xf32> to vector<1x32xf32>
    %8 = vector.extract_strided_slice %4 {offsets = [3, 0], sizes = [1, 32], strides = [1, 1]} : vector<6x32xf32> to vector<1x32xf32>
    %9 = vector.extract_strided_slice %4 {offsets = [4, 0], sizes = [1, 32], strides = [1, 1]} : vector<6x32xf32> to vector<1x32xf32>
    %10 = vector.extract_strided_slice %4 {offsets = [5, 0], sizes = [1, 32], strides = [1, 1]} : vector<6x32xf32> to vector<1x32xf32>
    %c0_9 = arith.constant 0 : index
    %c0_10 = arith.constant 0 : index
    %c0_11 = arith.constant 0 : index
    %11 = vector.load %arg1[%c0_9, %c0_10, %c0_11] : memref<1x8x32xf32, #tpu.memory_space<vmem>>, vector<1x8x32xf32>
    %12 = vector.shape_cast %11 : vector<1x8x32xf32> to vector<8x32xf32>
    %c0_12 = arith.constant 0 : index
    %c0_13 = arith.constant 0 : index
    %c0_14 = arith.constant 0 : index
    %13 = vector.load %arg2[%c0_12, %c0_13, %c0_14] : memref<1x8x32xf32, #tpu.memory_space<vmem>>, vector<1x8x32xf32>
    %14 = vector.shape_cast %13 : vector<1x8x32xf32> to vector<8x32xf32>
    %c0_15 = arith.constant 0 : index
    %c0_16 = arith.constant 0 : index
    %c0_17 = arith.constant 0 : index
    %15 = vector.load %arg3[%c0_15, %c0_16, %c0_17] : memref<1x8x32xf32, #tpu.memory_space<vmem>>, vector<1x8x32xf32>
    %16 = vector.shape_cast %15 : vector<1x8x32xf32> to vector<8x32xf32>
    %cst = arith.constant dense<0.000000e+00> : vector<8x32xf32>
    %17 = tpu.matmul %12, %0, %cst {dimension_numbers = #tpu.dot_dimension_numbers<[1], [0], [0], [1], [0, 0, 1, 1], [], []>} : vector<8x32xf32>, vector<32x32xf32>, vector<8x32xf32> -> vector<8x32xf32>
    %18 = vector.broadcast %5 : vector<1x32xf32> to vector<8x32xf32>
    %19 = arith.addf %17, %18 : vector<8x32xf32>
    %cst_18 = arith.constant 0.353553385 : f32
    %20 = vector.broadcast %cst_18 : f32 to vector<8x32xf32>
    %21 = arith.mulf %19, %20 : vector<8x32xf32>
    %cst_19 = arith.constant dense<0.000000e+00> : vector<8x32xf32>
    %22 = tpu.matmul %14, %1, %cst_19 {dimension_numbers = #tpu.dot_dimension_numbers<[1], [0], [0], [1], [0, 0, 1, 1], [], []>} : vector<8x32xf32>, vector<32x32xf32>, vector<8x32xf32> -> vector<8x32xf32>
    %23 = vector.broadcast %6 : vector<1x32xf32> to vector<8x32xf32>
    %24 = arith.addf %22, %23 : vector<8x32xf32>
    %cst_20 = arith.constant dense<0.000000e+00> : vector<8x32xf32>
    %25 = tpu.matmul %16, %2, %cst_20 {dimension_numbers = #tpu.dot_dimension_numbers<[1], [0], [0], [1], [0, 0, 1, 1], [], []>} : vector<8x32xf32>, vector<32x32xf32>, vector<8x32xf32> -> vector<8x32xf32>
    %26 = vector.broadcast %7 : vector<1x32xf32> to vector<8x32xf32>
    %27 = arith.addf %25, %26 : vector<8x32xf32>
    %28 = vector.extract_strided_slice %21 {offsets = [0, 0], sizes = [8, 8], strides = [1, 1]} : vector<8x32xf32> to vector<8x8xf32>
    %29 = vector.extract_strided_slice %24 {offsets = [0, 0], sizes = [8, 8], strides = [1, 1]} : vector<8x32xf32> to vector<8x8xf32>
    %cst_21 = arith.constant dense<0.000000e+00> : vector<8x8xf32>
    %30 = tpu.matmul %28, %29, %cst_21 {dimension_numbers = #tpu.dot_dimension_numbers<[1], [1], [0], [0], [0, 0, 1, 0], [], []>} : vector<8x8xf32>, vector<8x8xf32>, vector<8x8xf32> -> vector<8x8xf32>
    %cst_22 = arith.constant dense<0xFF800000> : vector<8xf32>
    %31 = vector.multi_reduction <maximumf>, %30, %cst_22 [1] : vector<8x8xf32> to vector<8xf32>
    %32 = vector.shape_cast %31 : vector<8xf32> to vector<8x1xf32>
    %33 = vector.broadcast %32 : vector<8x1xf32> to vector<8x8xf32>
    %34 = arith.subf %30, %33 : vector<8x8xf32>
    %35 = math.exp %34 : vector<8x8xf32>
    %cst_23 = arith.constant dense<0.000000e+00> : vector<8xf32>
    %36 = vector.multi_reduction <add>, %35, %cst_23 [1] : vector<8x8xf32> to vector<8xf32>
    %37 = vector.shape_cast %36 : vector<8xf32> to vector<8x1xf32>
    %38 = tpu.reciprocal %37 {approx = true} : vector<8x1xf32> -> vector<8x1xf32>
    %39 = vector.broadcast %38 : vector<8x1xf32> to vector<8x8xf32>
    %40 = arith.mulf %35, %39 : vector<8x8xf32>
    %41 = vector.extract_strided_slice %27 {offsets = [0, 0], sizes = [8, 8], strides = [1, 1]} : vector<8x32xf32> to vector<8x8xf32>
    %cst_24 = arith.constant dense<0.000000e+00> : vector<8x8xf32>
    %42 = tpu.matmul %40, %41, %cst_24 {dimension_numbers = #tpu.dot_dimension_numbers<[1], [0], [0], [1], [0, 0, 1, 1], [], []>} : vector<8x8xf32>, vector<8x8xf32>, vector<8x8xf32> -> vector<8x8xf32>
    %43 = vector.extract_strided_slice %21 {offsets = [0, 8], sizes = [8, 8], strides = [1, 1]} : vector<8x32xf32> to vector<8x8xf32>
    %44 = vector.extract_strided_slice %24 {offsets = [0, 8], sizes = [8, 8], strides = [1, 1]} : vector<8x32xf32> to vector<8x8xf32>
    %cst_25 = arith.constant dense<0.000000e+00> : vector<8x8xf32>
    %45 = tpu.matmul %43, %44, %cst_25 {dimension_numbers = #tpu.dot_dimension_numbers<[1], [1], [0], [0], [0, 0, 1, 0], [], []>} : vector<8x8xf32>, vector<8x8xf32>, vector<8x8xf32> -> vector<8x8xf32>
    %cst_26 = arith.constant dense<0xFF800000> : vector<8xf32>
    %46 = vector.multi_reduction <maximumf>, %45, %cst_26 [1] : vector<8x8xf32> to vector<8xf32>
    %47 = vector.shape_cast %46 : vector<8xf32> to vector<8x1xf32>
    %48 = vector.broadcast %47 : vector<8x1xf32> to vector<8x8xf32>
    %49 = arith.subf %45, %48 : vector<8x8xf32>
    %50 = math.exp %49 : vector<8x8xf32>
    %cst_27 = arith.constant dense<0.000000e+00> : vector<8xf32>
    %51 = vector.multi_reduction <add>, %50, %cst_27 [1] : vector<8x8xf32> to vector<8xf32>
    %52 = vector.shape_cast %51 : vector<8xf32> to vector<8x1xf32>
    %53 = tpu.reciprocal %52 {approx = true} : vector<8x1xf32> -> vector<8x1xf32>
    %54 = vector.broadcast %53 : vector<8x1xf32> to vector<8x8xf32>
    %55 = arith.mulf %50, %54 : vector<8x8xf32>
    %56 = vector.extract_strided_slice %27 {offsets = [0, 8], sizes = [8, 8], strides = [1, 1]} : vector<8x32xf32> to vector<8x8xf32>
    %cst_28 = arith.constant dense<0.000000e+00> : vector<8x8xf32>
    %57 = tpu.matmul %55, %56, %cst_28 {dimension_numbers = #tpu.dot_dimension_numbers<[1], [0], [0], [1], [0, 0, 1, 1], [], []>} : vector<8x8xf32>, vector<8x8xf32>, vector<8x8xf32> -> vector<8x8xf32>
    %58 = vector.extract_strided_slice %21 {offsets = [0, 16], sizes = [8, 8], strides = [1, 1]} : vector<8x32xf32> to vector<8x8xf32>
    %59 = vector.extract_strided_slice %24 {offsets = [0, 16], sizes = [8, 8], strides = [1, 1]} : vector<8x32xf32> to vector<8x8xf32>
    %cst_29 = arith.constant dense<0.000000e+00> : vector<8x8xf32>
    %60 = tpu.matmul %58, %59, %cst_29 {dimension_numbers = #tpu.dot_dimension_numbers<[1], [1], [0], [0], [0, 0, 1, 0], [], []>} : vector<8x8xf32>, vector<8x8xf32>, vector<8x8xf32> -> vector<8x8xf32>
    %cst_30 = arith.constant dense<0xFF800000> : vector<8xf32>
    %61 = vector.multi_reduction <maximumf>, %60, %cst_30 [1] : vector<8x8xf32> to vector<8xf32>
    %62 = vector.shape_cast %61 : vector<8xf32> to vector<8x1xf32>
    %63 = vector.broadcast %62 : vector<8x1xf32> to vector<8x8xf32>
    %64 = arith.subf %60, %63 : vector<8x8xf32>
    %65 = math.exp %64 : vector<8x8xf32>
    %cst_31 = arith.constant dense<0.000000e+00> : vector<8xf32>
    %66 = vector.multi_reduction <add>, %65, %cst_31 [1] : vector<8x8xf32> to vector<8xf32>
    %67 = vector.shape_cast %66 : vector<8xf32> to vector<8x1xf32>
    %68 = tpu.reciprocal %67 {approx = true} : vector<8x1xf32> -> vector<8x1xf32>
    %69 = vector.broadcast %68 : vector<8x1xf32> to vector<8x8xf32>
    %70 = arith.mulf %65, %69 : vector<8x8xf32>
    %71 = vector.extract_strided_slice %27 {offsets = [0, 16], sizes = [8, 8], strides = [1, 1]} : vector<8x32xf32> to vector<8x8xf32>
    %cst_32 = arith.constant dense<0.000000e+00> : vector<8x8xf32>
    %72 = tpu.matmul %70, %71, %cst_32 {dimension_numbers = #tpu.dot_dimension_numbers<[1], [0], [0], [1], [0, 0, 1, 1], [], []>} : vector<8x8xf32>, vector<8x8xf32>, vector<8x8xf32> -> vector<8x8xf32>
    %73 = vector.extract_strided_slice %21 {offsets = [0, 24], sizes = [8, 8], strides = [1, 1]} : vector<8x32xf32> to vector<8x8xf32>
    %74 = vector.extract_strided_slice %24 {offsets = [0, 24], sizes = [8, 8], strides = [1, 1]} : vector<8x32xf32> to vector<8x8xf32>
    %cst_33 = arith.constant dense<0.000000e+00> : vector<8x8xf32>
    %75 = tpu.matmul %73, %74, %cst_33 {dimension_numbers = #tpu.dot_dimension_numbers<[1], [1], [0], [0], [0, 0, 1, 0], [], []>} : vector<8x8xf32>, vector<8x8xf32>, vector<8x8xf32> -> vector<8x8xf32>
    %cst_34 = arith.constant dense<0xFF800000> : vector<8xf32>
    %76 = vector.multi_reduction <maximumf>, %75, %cst_34 [1] : vector<8x8xf32> to vector<8xf32>
    %77 = vector.shape_cast %76 : vector<8xf32> to vector<8x1xf32>
    %78 = vector.broadcast %77 : vector<8x1xf32> to vector<8x8xf32>
    %79 = arith.subf %75, %78 : vector<8x8xf32>
    %80 = math.exp %79 : vector<8x8xf32>
    %cst_35 = arith.constant dense<0.000000e+00> : vector<8xf32>
    %81 = vector.multi_reduction <add>, %80, %cst_35 [1] : vector<8x8xf32> to vector<8xf32>
    %82 = vector.shape_cast %81 : vector<8xf32> to vector<8x1xf32>
    %83 = tpu.reciprocal %82 {approx = true} : vector<8x1xf32> -> vector<8x1xf32>
    %84 = vector.broadcast %83 : vector<8x1xf32> to vector<8x8xf32>
    %85 = arith.mulf %80, %84 : vector<8x8xf32>
    %86 = vector.extract_strided_slice %27 {offsets = [0, 24], sizes = [8, 8], strides = [1, 1]} : vector<8x32xf32> to vector<8x8xf32>
    %cst_36 = arith.constant dense<0.000000e+00> : vector<8x8xf32>
    %87 = tpu.matmul %85, %86, %cst_36 {dimension_numbers = #tpu.dot_dimension_numbers<[1], [0], [0], [1], [0, 0, 1, 1], [], []>} : vector<8x8xf32>, vector<8x8xf32>, vector<8x8xf32> -> vector<8x8xf32>
    %88 = tpu.concatenate %42, %57, %72, %87 in 1 : vector<8x8xf32>, vector<8x8xf32>, vector<8x8xf32>, vector<8x8xf32> -> vector<8x32xf32>
    %cst_37 = arith.constant dense<0.000000e+00> : vector<8x32xf32>
    %89 = tpu.matmul %88, %3, %cst_37 {dimension_numbers = #tpu.dot_dimension_numbers<[1], [0], [0], [1], [0, 0, 1, 1], [], []>} : vector<8x32xf32>, vector<32x32xf32>, vector<8x32xf32> -> vector<8x32xf32>
    %90 = vector.broadcast %8 : vector<1x32xf32> to vector<8x32xf32>
    %91 = arith.addf %89, %90 : vector<8x32xf32>
    %92 = arith.addf %91, %12 : vector<8x32xf32>
    %cst_38 = arith.constant dense<0.000000e+00> : vector<8xf32>
    %93 = vector.multi_reduction <add>, %92, %cst_38 [1] : vector<8x32xf32> to vector<8xf32>
    %94 = vector.shape_cast %93 : vector<8xf32> to vector<8x1xf32>
    %cst_39 = arith.constant 3.200000e+01 : f32
    %95 = vector.broadcast %cst_39 : f32 to vector<8x1xf32>
    %96 = arith.divf %94, %95 : vector<8x1xf32>
    %97 = vector.broadcast %96 : vector<8x1xf32> to vector<8x32xf32>
    %98 = arith.subf %92, %97 : vector<8x32xf32>
    %99 = arith.mulf %98, %98 : vector<8x32xf32>
    %cst_40 = arith.constant dense<0.000000e+00> : vector<8xf32>
    %100 = vector.multi_reduction <add>, %99, %cst_40 [1] : vector<8x32xf32> to vector<8xf32>
    %101 = vector.shape_cast %100 : vector<8xf32> to vector<8x1xf32>
    %cst_41 = arith.constant 3.200000e+01 : f32
    %102 = vector.broadcast %cst_41 : f32 to vector<8x1xf32>
    %103 = arith.divf %101, %102 : vector<8x1xf32>
    %cst_42 = arith.constant 9.99999974E-6 : f32
    %104 = vector.broadcast %cst_42 : f32 to vector<8x1xf32>
    %105 = arith.addf %103, %104 : vector<8x1xf32>
    %106 = math.rsqrt %105 : vector<8x1xf32>
    %107 = vector.broadcast %106 : vector<8x1xf32> to vector<8x32xf32>
    %108 = arith.mulf %98, %107 : vector<8x32xf32>
    %109 = vector.broadcast %9 : vector<1x32xf32> to vector<8x32xf32>
    %110 = arith.mulf %108, %109 : vector<8x32xf32>
    %111 = vector.broadcast %10 : vector<1x32xf32> to vector<8x32xf32>
    %112 = arith.addf %110, %111 : vector<8x32xf32>
    %113 = vector.shape_cast %112 : vector<8x32xf32> to vector<1x8x32xf32>
    %c0_43 = arith.constant 0 : index
    %c0_44 = arith.constant 0 : index
    %c0_45 = arith.constant 0 : index
    %114 = vector.load %arg9[%c0_43, %c0_44, %c0_45] : memref<1x8x32xf32, #tpu.memory_space<vmem>>, vector<1x8x32xf32>
    tpu.vector_store %arg9[%c0_43, %c0_44, %c0_45], %113 {strides = array<i32>} : memref<1x8x32xf32, #tpu.memory_space<vmem>>, vector<1x8x32xf32>,
    return
  }
  func.func @transform_0(%arg0: i32) -> (i32, i32, i32) {
    %c0_i32 = arith.constant 0 : i32
    %c0_i32_0 = arith.constant 0 : i32
    %c0_i32_1 = arith.constant 0 : i32
    return %arg0, %c0_i32, %c0_i32_0 : i32, i32, i32
  }
  func.func @transform_1(%arg0: i32) -> (i32, i32, i32) {
    %c0_i32 = arith.constant 0 : i32
    %c0_i32_0 = arith.constant 0 : i32
    %c0_i32_1 = arith.constant 0 : i32
    return %arg0, %c0_i32, %c0_i32_0 : i32, i32, i32
  }
  func.func @transform_2(%arg0: i32) -> (i32, i32, i32) {
    %c0_i32 = arith.constant 0 : i32
    %c0_i32_0 = arith.constant 0 : i32
    %c0_i32_1 = arith.constant 0 : i32
    return %arg0, %c0_i32, %c0_i32_0 : i32, i32, i32
  }
  func.func @transform_3(%arg0: i32) -> (i32, i32) {
    %c0_i32 = arith.constant 0 : i32
    %c0_i32_0 = arith.constant 0 : i32
    %c0_i32_1 = arith.constant 0 : i32
    return %c0_i32, %c0_i32_0 : i32, i32
  }
  func.func @transform_4(%arg0: i32) -> (i32, i32) {
    %c0_i32 = arith.constant 0 : i32
    %c0_i32_0 = arith.constant 0 : i32
    %c0_i32_1 = arith.constant 0 : i32
    return %c0_i32, %c0_i32_0 : i32, i32
  }
  func.func @transform_5(%arg0: i32) -> (i32, i32) {
    %c0_i32 = arith.constant 0 : i32
    %c0_i32_0 = arith.constant 0 : i32
    %c0_i32_1 = arith.constant 0 : i32
    return %c0_i32, %c0_i32_0 : i32, i32
  }
  func.func @transform_6(%arg0: i32) -> (i32, i32) {
    %c0_i32 = arith.constant 0 : i32
    %c0_i32_0 = arith.constant 0 : i32
    %c0_i32_1 = arith.constant 0 : i32
    return %c0_i32, %c0_i32_0 : i32, i32
  }
  func.func @transform_7(%arg0: i32) -> (i32, i32) {
    %c0_i32 = arith.constant 0 : i32
    %c0_i32_0 = arith.constant 0 : i32
    %c0_i32_1 = arith.constant 0 : i32
    return %c0_i32, %c0_i32_0 : i32, i32
  }
  func.func @transform_8(%arg0: i32) -> (i32, i32, i32) {
    %c0_i32 = arith.constant 0 : i32
    %c0_i32_0 = arith.constant 0 : i32
    %c0_i32_1 = arith.constant 0 : i32
    return %arg0, %c0_i32, %c0_i32_0 : i32, i32, i32
  }
}

</mosaic_0001>

<bundles_post_ra>
// kernel: tpu_custom_call.1
= control target key start
LH: loop header
LB: loop body
LE: loop exit
PB: predicated region body
PF: predicated region fallthrough
CT: control target
= control target key end

     0   :  { %s2776_s0 = inlined_call_operand.hbm [shape: f32[2,8,32], index: 0, kind: input, shape index: {}]   ;;  %s2777_s1 = inlined_call_operand.hbm [shape: f32[2,8,32], index: 1, kind: input, shape index: {}]   ;;  %s2778_s2 = inlined_call_operand.hbm [shape: f32[2,8,32], index: 2, kind: input, shape index: {}]   ;;  %s2779_s3 = inlined_call_operand.hbm [shape: f32[32,32], index: 3, kind: input, shape index: {}]   ;;  %s2780_s4 = inlined_call_operand.hbm [shape: f32[32,32], index: 4, kind: input, shape index: {}]   ;;  %s2781_s5 = inlined_call_operand.hbm [shape: f32[32,32], index: 5, kind: input, shape index: {}]   ;;  %s2782_s6 = inlined_call_operand.hbm [shape: f32[32,32], index: 6, kind: input, shape index: {}]   ;;  %s2783_s7 = inlined_call_operand.vmem [shape: f32[6,32], index: 7, kind: input, shape index: {}]   ;;  %s2784_s8 = inlined_call_operand.hbm [shape: f32[2,8,32], index: 8, kind: output, shape index: {}]  }
   0x1   :  { %2810 = sst [smem:[#allocation26_spill]] %s2777_s1 }
   0x2   :  { %2811 = sst [smem:[#allocation27_spill]] %s2779_s3 }
   0x3   :  { %2812 = sst [smem:[#allocation28_spill]] %s2781_s5 }
   0x4   :  { %2813 = sst [smem:[#allocation29_spill]] %s2784_s8 }
   0x5   :  { %13 = vsyncpa [#allocation3], 0 }
   0x6   :  { %15 = vsyncpa [#allocation3 + $0x1], 0 }
   0x7   :  { %16 = vsyncpa [#allocation6], 0 }
   0x8   :  { %18 = vsyncpa [#allocation6 + $0x1], 0 }
   0x9   :  { %19 = vsyncpa [#allocation9], 0 }
   0xa   :  { %20 = vsyncpa [#allocation12], 0 }
   0xb   :  { %21 = vsyncpa [#allocation4], 0 }
   0xc   :  { %23 = vsyncpa [#allocation4 + $0x1], 0  ;;  %s2303_s27 = smov 0   ;;  %s2305_s28 = smov 0  }
   0xd   :  { %s2307_s29 = smov 0   ;;  %s2309_s30 = smov 0  }
   0xe LB: > { %2814 = sst [smem:[#allocation20_spill]] %s2225_s27  ;;  %s2239_s9 = smov [#allocation8]   ;;  %s2237_s30 = sphi %s2309_s30, %s2853_s30   ;;  %s2233_s29 = sphi %s2307_s29, %s2857_s29   ;;  %s2229_s28 = sphi %s2305_s28, %s2856_s28   ;;  %s2225_s27 = sphi %s2303_s27, %s2855_s27  }
   0xf   : > { %2815 = sst [smem:[#allocation21_spill]] %s2237_s30  ;;  %s255_s10 = sshll.u32 %s2239_s9, 4  ;;  %s2329_s10 = int_to_ptr.vmem [resolvable:$true] %s255_s10 }
  0x10   : > { %s2324_s11 = sadd.s32 4294967295, %s2237_s30   ;;  %p1646_p0 = scmp.ge.s32.totalorder %s2237_s30, 1 }
  0x11   : > { %p2795_p1 = scmp.eq.s32.totalorder %s2324_s11, 0  ;;  %p243_p2 = scmp.lt.s32.totalorder %s2237_s30, 3 }
  0x12   : > { %s2240_s13 = smov [#allocation11]   ;;  %s2818_s3 = sld [smem:[#allocation27_spill]] }
  0x13   : > { %p2331_p3 = pnand %p1646_p0, %p243_p2  ;;  %s281_s14 = sshll.u32 %s2240_s13, 4  ;;  %s2344_s14 = int_to_ptr.vmem [resolvable:$true] %s281_s14 }
  0x15   : > { %s2816_s12 = scalar_select %p2331_p3, 1, 0 }
  0x16   : > { %p1855_p5 = pneg %p2331_p3 }
  0x18   : > { %p2340_p6 = pnand %p1855_p5, %p2795_p1  ;;  %s1957_s18 = scalar_lea.hbm %s2818_s3, 512 }
  0x19   : > { %p1958_p7 = scmp.ne.s32.totalorder %s2818_s3, %s1957_s18  ;;  %p1964_p11 = scmp.lt.u32.totalorder %s1957_s18, %s2818_s3 }
  0x1a   : > { %s2817_s15 = scalar_select %p2340_p6, 1, 0 }
  0x1b   : > { %p2354_p8 = pneg %p2340_p6 }
  0x1d   : > { %s2819_s21 = scalar_select %p2354_p8, 1, 0 }
  0x1e   : > { %p1960_p9 = pnand %p2354_p8, %p1958_p7 }
  0x20   : > { %p1961_p10 = pneg %p1960_p9 }
  0x22   : > { %p1966_p12 = pnand %p1964_p11, %p1961_p10 }
  0x24   : > { %1969 = shalt.err (!%p1966_p12)
}
  0x25   : > { %s1970_s24 = scalar_lea.vmem %s2329_s10, 512  ;;  %p1978_p5 = scmp.lt.s32.totalorder %s2329_s10, %s2329_s10 }
  0x26   : > { %p1971_p13 = scmp.ne.s32.totalorder %s2329_s10, %s1970_s24  ;;  %p1979_p4 = scmp.lt.s32.totalorder %s1970_s24, %s1970_s24 }
  0x28   : > { %p1973_p0 = pnand %p1971_p13, %p2354_p8  ;;  %p1980_p7 = por %p1979_p4, %p1978_p5 }
  0x2a   : > { %p1974_p2 = pneg %p1973_p0 }
  0x2c   : > { %p1981_p9 = pnand %p1980_p7, %p1974_p2 }
  0x2e   : > { %1984 = shalt.err (!%p1981_p9)
}
  0x2f   : > { %s2786_s25 = smov 128   ;;  %s2789_s26 = smov 8  }
  0x30   : > { %1858 = dma.hbm_to_vmem [thread:$0]  (!%p2340_p6), %s2818_s3, 512, %s2329_s10, [#allocation9], %s2786_s25, %s2786_s25, %s2789_s26  }
  0x31   : > { %s2820_s5 = sld [smem:[#allocation28_spill]] }
  0x37   : > { %s1985_s18 = scalar_lea.hbm %s2820_s5, 512 }
  0x38   : > { %p1986_p4 = scmp.ne.s32.totalorder %s2820_s5, %s1985_s18  ;;  %p1992_p12 = scmp.lt.u32.totalorder %s1985_s18, %s2820_s5 }
  0x3a   : > { %p1988_p10 = pnand %p1986_p4, %p2354_p8 }
  0x3c   : > { %p1989_p11 = pneg %p1988_p10 }
  0x3e   : > { %p1994_p13 = pnand %p1992_p12, %p1989_p11 }
  0x40   : > { %1997 = shalt.err (!%p1994_p13)
}
  0x41   : > { %s1998_s10 = scalar_lea.vmem %s2344_s14, 512  ;;  %p2006_p7 = scmp.lt.s32.totalorder %s2344_s14, %s2344_s14 }
  0x42   : > { %p1999_p0 = scmp.ne.s32.totalorder %s2344_s14, %s1998_s10  ;;  %p2007_p9 = scmp.lt.s32.totalorder %s1998_s10, %s1998_s10 }
  0x44   : > { %p2001_p2 = pnand %p1999_p0, %p2354_p8  ;;  %p2008_p4 = por %p2007_p9, %p2006_p7 }
  0x46   : > { %p2002_p5 = pneg %p2001_p2 }
  0x48   : > { %p2009_p10 = pnand %p2008_p4, %p2002_p5 }
  0x4a   : > { %2012 = shalt.err (!%p2009_p10)
}
  0x4b   : > { %1864 = dma.hbm_to_vmem [thread:$0]  (!%p2340_p6), %s2820_s5, 512, %s2344_s14, [#allocation12], %s2786_s25, %s2786_s25, %s2789_s26  }
  0x4c   : > { %s1645_s13 = sadd.s32 4294967294, %s2237_s30   ;;  %s2406_s16 = sadd.s32 1, %s2237_s30  }
  0x4d   : > { %2821 = sst [smem:[#allocation22_spill]] %s2406_s16  ;;  %s33_s17 = ssub.s32 %s2237_s30, %s2406_s16 }
  0x4e   : > { %s36_s18 = sadd.s32 1, %s2233_s29  ;;  %p34_p11 = scmp.eq.s32.totalorder %s33_s17, 0 }
  0x4f   : > { %p43_p12 = scmp.ne.s32.totalorder %s2233_s29, %s2229_s28  ;;  %p44_p13 = scmp.eq.s32.totalorder %s2237_s30, 0 }
  0x50   : > { %p49_p0 = scmp.ne.s32.totalorder %s2229_s28, %s2225_s27  ;;  %p230_p7 = scmp.eq.s32.totalorder %s2324_s11, 1 }
  0x51   : > { %s2417_s19 = scalar_select %p34_p11, %s2233_s29, %s36_s18  }
  0x52   : > { %p45_p2 = por %p44_p13, %p43_p12  ;;  %p2421_p5 = por %p2795_p1, %p49_p0 }
  0x53   : > { %2822 = sst [smem:[#allocation23_spill]] %s2417_s19  ;;  %p236_p9 = scmp.eq.s32.totalorder %s1645_s13, 1 }
  0x54   : > { %s2823_s20 = scalar_select %p2421_p5, 1, 0 }
  0x55   : > { %p1886_p4 = scmp.lt.s32.totalorder %s2237_s30, 2  ;;  %s2788_s14 = sand.u32 1, %s2233_s29  }
  0x56   : > { %p2428_p10 = por %p230_p7, %p43_p12  ;;  %p2432_p3 = por %p236_p9, %p49_p0 }
  0x57   : > { %s2438_s10 = sshll.u32 %s2788_s14, 3  ;;  %s2441_s24 = sshll.u32 %s2237_s30, 7 }
  0x58   : > { %s2824_s22 = scalar_select %p2428_p10, 1, 0 }
  0x59   : > { %s2826_s23 = scalar_select %p2432_p3, 1, 0 }
  0x5a   : > { %2825 = sst [smem:[#allocation24_spill]] %s2824_s22  ;;  %p2443_p11 = pnand %p1886_p4, %p45_p2 }
  0x5b   : > { %2827 = sst [smem:[#allocation25_spill]] %s2826_s23  ;;  %s329_s13 = sand.u32 1, %s2237_s30  }
  0x5c   : > { %s2828_s9 = scalar_select %p2443_p11, 1, 0 }
  0x5d   : > { %s2829_s1 = sld [smem:[#allocation26_spill]]  ;;  %s333_s14 = scalar_lea.vmem [#allocation5], %s2438_s10 }
  0x5e   : > { %s340_s26 = sshll.u32 %s333_s14, 4  ;;  %s2243_s3 = smov [#allocation10]   ;;  %s2455_s26 = int_to_ptr.vmem [resolvable:$true] %s340_s26 }
  0x5f   : > { %s2457_s5 = sshll.u32 %s2243_s3, 4  ;;  %s2459_s19 = scalar_lea.sflag [#allocation6], %s329_s13  ;;  %s269_s5 = int_to_ptr.vmem [resolvable:$true] %s2457_s5 }
  0x60   : > { %p2465_p13 = pneg %p2443_p11 }
  0x62   : > { %s2830_s17 = scalar_select %p2465_p13, 1, 0 }
  0x63   : > { %s2452_s25 = scalar_lea.hbm %s2829_s1, %s2441_s24  ;;  %s2018_s30 = scalar_lea.hbm %s2829_s1, 256 }
  0x64   : > { %s2013_s16 = scalar_lea.hbm %s2452_s25, 128  ;;  %p2019_p7 = scmp.lt.u32.totalorder %s2452_s25, %s2829_s1 }
  0x65   : > { %p2014_p12 = scmp.ne.s32.totalorder %s2452_s25, %s2013_s16  ;;  %p2020_p9 = scmp.lt.u32.totalorder %s2018_s30, %s2013_s16 }
  0x66   : > { %p2022_p1 = scmp.lt.u32.totalorder %s2013_s16, %s2452_s25 }
  0x67   : > { %p2016_p0 = pnand %p2465_p13, %p2014_p12  ;;  %p2021_p4 = por %p2020_p9, %p2019_p7 }
  0x69   : > { %p2017_p2 = pneg %p2016_p0  ;;  %p2023_p3 = por %p2022_p1, %p2021_p4 }
  0x6b   : > { %p2024_p10 = pnand %p2023_p3, %p2017_p2 }
  0x6d   : > { %2027 = shalt.err (!%p2024_p10)
}
  0x6e   : > { %s2028_s13 = scalar_lea.vmem %s2455_s26, 128  ;;  %s2244_s18 = smov [#allocation5]  }
  0x6f   : > { %p2029_p12 = scmp.ne.s32.totalorder %s2455_s26, %s2028_s13  ;;  %s2033_s14 = sshll.u32 %s2244_s18, 4  ;;  %s2034_s14 = int_to_ptr.vmem [resolvable:$false] %s2033_s14 }
  0x70   : > { %s2035_s23 = scalar_lea.vmem %s2034_s14, 256  ;;  %p2036_p6 = scmp.lt.s32.totalorder %s2455_s26, %s2034_s14 }
  0x71   : > { %p2031_p0 = pnand %p2029_p12, %p2465_p13  ;;  %p2037_p8 = scmp.lt.s32.totalorder %s2035_s23, %s2028_s13 }
  0x73   : > { %p2032_p5 = pneg %p2031_p0  ;;  %p2038_p7 = por %p2037_p8, %p2036_p6 }
  0x75   : > { %p2039_p9 = pnand %p2038_p7, %p2032_p5 }
  0x77   : > { %2042 = shalt.err (!%p2039_p9)
}
  0x78   : > { %1874 = dma.hbm_to_vmem [thread:$0]  (!%p2443_p11), %s2452_s25, 128, %s2455_s26, %s2459_s19  }
  0x79   : > { %s2043_s3 = scalar_lea.hbm %s2780_s4, 512  ;;  %p2831_p3 = scmp.ne.s32.totalorder %s2819_s21, 0 }
  0x7a   : > { %p2044_p1 = scmp.ne.s32.totalorder %s2780_s4, %s2043_s3  ;;  %p2050_p5 = scmp.lt.u32.totalorder %s2043_s3, %s2780_s4 }
  0x7c   : > { %p2046_p6 = pnand %p2044_p1, %p2831_p3 }
  0x7e   : > { %p2047_p8 = pneg %p2046_p6 }
  0x80   : > { %p2052_p10 = pnand %p2050_p5, %p2047_p8 }
  0x82   : > { %2055 = shalt.err (!%p2052_p10)
}
  0x83   : > { %s2056_s23 = scalar_lea.vmem %s269_s5, 512  ;;  %p2064_p0 = scmp.lt.s32.totalorder %s269_s5, %s269_s5 }
  0x84   : > { %p2057_p2 = scmp.ne.s32.totalorder %s269_s5, %s2056_s23  ;;  %p2065_p7 = scmp.lt.s32.totalorder %s2056_s23, %s2056_s23 }
  0x86   : > { %p2059_p4 = pnand %p2057_p2, %p2831_p3  ;;  %p2066_p9 = por %p2065_p7, %p2064_p0 }
  0x88   : > { %p2060_p12 = pneg %p2059_p4 }
  0x8a   : > { %p2067_p11 = pnand %p2066_p9, %p2060_p12 }
  0x8c   : > { %2070 = shalt.err (!%p2067_p11)
}
  0x8d   : > { %p2832_p1 = scmp.ne.s32.totalorder %s2817_s15, 0  ;;  %s2833_s1 = smov 8  }
  0x8e   : > { %s2834_s25 = smov 128   ;;  %s2245_s16 = smov [#allocation13]  }
  0x8f   : > { %1861 = dma.hbm_to_vmem [thread:$0]  (!%p2832_p1), %s2780_s4, 512, %s269_s5, [#allocation9], %s2834_s25, %s2834_s25, %s2833_s1  }
  0x90   : > { %s294_s3 = sshll.u32 %s2245_s16, 4  ;;  %s2071_s14 = scalar_lea.hbm %s2782_s6, 512  ;;  %s295_s3 = int_to_ptr.vmem [resolvable:$true] %s294_s3 }
  0x91   : > { %p2072_p11 = scmp.ne.s32.totalorder %s2782_s6, %s2071_s14  ;;  %p2078_p5 = scmp.lt.u32.totalorder %s2071_s14, %s2782_s6 }
  0x93   : > { %p2074_p6 = pnand %p2072_p11, %p2831_p3 }
  0x95   : > { %p2075_p8 = pneg %p2074_p6 }
  0x97   : > { %p2080_p10 = pnand %p2078_p5, %p2075_p8 }
  0x99   : > { %2083 = shalt.err (!%p2080_p10)
}
  0x9a   : > { %s2084_s5 = scalar_lea.vmem %s295_s3, 512  ;;  %p2092_p0 = scmp.lt.s32.totalorder %s295_s3, %s295_s3 }
  0x9b   : > { %p2085_p2 = scmp.ne.s32.totalorder %s295_s3, %s2084_s5  ;;  %p2093_p7 = scmp.lt.s32.totalorder %s2084_s5, %s2084_s5 }
  0x9d   : > { %p2087_p4 = pnand %p2085_p2, %p2831_p3  ;;  %p2094_p9 = por %p2093_p7, %p2092_p0 }
  0x9f   : > { %p2088_p12 = pneg %p2087_p4 }
  0xa1   : > { %p2095_p13 = pnand %p2094_p9, %p2088_p12 }
  0xa3   : > { %2098 = shalt.err (!%p2095_p13)
}
  0xa4   : > { %1867 = dma.hbm_to_vmem [thread:$0]  (!%p2832_p1), %s2782_s6, 512, %s295_s3, [#allocation12], %s2834_s25, %s2834_s25, %s2833_s1  }
  0xa5   : > { %s2536_s26 = scalar_lea.hbm %s2776_s0, %s2441_s24  ;;  %s315_s15 = scalar_lea.vmem [#allocation2], %s2438_s10 }
  0xa6   : > { %s322_s30 = sshll.u32 %s315_s15, 4  ;;  %s2835_s16 = sand.u32 1, %s2233_s29   ;;  %s323_s30 = int_to_ptr.vmem [resolvable:$true] %s322_s30 }
  0xa7   : > { %s312_s18 = scalar_lea.sflag [#allocation3], %s2835_s16  ;;  %s2099_s13 = scalar_lea.hbm %s2536_s26, 128 }
  0xa8   : > { %p2100_p13 = scmp.ne.s32.totalorder %s2536_s26, %s2099_s13  ;;  %p2836_p3 = scmp.ne.s32.totalorder %s2830_s17, 0 }
  0xa9   : > { %s2104_s3 = scalar_lea.hbm %s2776_s0, 256  ;;  %p2105_p1 = scmp.lt.u32.totalorder %s2536_s26, %s2776_s0 }
  0xaa   : > { %p2102_p11 = pnand %p2100_p13, %p2836_p3  ;;  %p2106_p8 = scmp.lt.u32.totalorder %s2104_s3, %s2099_s13 }
  0xab   : > { %p2108_p10 = scmp.lt.u32.totalorder %s2099_s13, %s2536_s26 }
  0xac   : > { %p2103_p6 = pneg %p2102_p11  ;;  %p2107_p5 = por %p2106_p8, %p2105_p1 }
  0xae   : > { %p2109_p2 = por %p2108_p10, %p2107_p5 }
  0xb0   : > { %p2110_p4 = pnand %p2109_p2, %p2103_p6 }
  0xb2   : > { %2113 = shalt.err (!%p2110_p4)
}
  0xb3   : > { %s2114_s5 = scalar_lea.vmem %s323_s30, 128  ;;  %s2246_s8 = smov [#allocation2]  }
  0xb4   : > { %p2115_p12 = scmp.ne.s32.totalorder %s323_s30, %s2114_s5  ;;  %s2119_s27 = sshll.u32 %s2246_s8, 4  ;;  %s2120_s27 = int_to_ptr.vmem [resolvable:$false] %s2119_s27 }
  0xb5   : > { %s2121_s21 = scalar_lea.vmem %s2120_s27, 256  ;;  %p2122_p9 = scmp.lt.s32.totalorder %s323_s30, %s2120_s27 }
  0xb6   : > { %p2117_p0 = pnand %p2115_p12, %p2836_p3  ;;  %p2123_p13 = scmp.lt.s32.totalorder %s2121_s21, %s2114_s5 }
  0xb8   : > { %p2118_p7 = pneg %p2117_p0  ;;  %p2124_p11 = por %p2123_p13, %p2122_p9 }
  0xba   : > { %p2125_p1 = pnand %p2124_p11, %p2118_p7 }
  0xbc   : > { %2128 = shalt.err (!%p2125_p1)
}
  0xbd   : > { %p2837_p8 = scmp.ne.s32.totalorder %s2828_s9, 0  ;;  %s2562_s16 = scalar_lea.hbm %s2778_s2, %s2441_s24 }
  0xbe   : > { %s351_s13 = scalar_lea.vmem [#allocation7], %s2438_s10  ;;  %s2129_s25 = scalar_lea.hbm %s2562_s16, 128 }
  0xbf   : > { %1871 = dma.hbm_to_vmem [thread:$0]  (!%p2837_p8), %s2536_s26, 128, %s323_s30, %s312_s18  }
  0xc0   : > { %s358_s1 = sshll.u32 %s351_s13, 4  ;;  %p2130_p6 = scmp.ne.s32.totalorder %s2562_s16, %s2129_s25  ;;  %s359_s1 = int_to_ptr.vmem [resolvable:$true] %s358_s1 }
  0xc1   : > { %s2134_s26 = scalar_lea.hbm %s2778_s2, 256  ;;  %p2135_p2 = scmp.lt.u32.totalorder %s2562_s16, %s2778_s2 }
  0xc2   : > { %p2132_p5 = pnand %p2130_p6, %p2836_p3  ;;  %p2136_p4 = scmp.lt.u32.totalorder %s2134_s26, %s2129_s25 }
  0xc3   : > { %p2138_p0 = scmp.lt.u32.totalorder %s2129_s25, %s2562_s16 }
  0xc4   : > { %p2133_p10 = pneg %p2132_p5  ;;  %p2137_p12 = por %p2136_p4, %p2135_p2 }
  0xc6   : > { %p2139_p7 = por %p2138_p0, %p2137_p12 }
  0xc8   : > { %p2140_p9 = pnand %p2139_p7, %p2133_p10 }
  0xca   : > { %2143 = shalt.err (!%p2140_p9)
}
  0xcb   : > { %s2144_s10 = scalar_lea.vmem %s359_s1, 128  ;;  %s2247_s24 = smov [#allocation7]  }
  0xcc   : > { %p2145_p13 = scmp.ne.s32.totalorder %s359_s1, %s2144_s10  ;;  %s2149_s23 = sshll.u32 %s2247_s24, 4  ;;  %s2150_s23 = int_to_ptr.vmem [resolvable:$false] %s2149_s23 }
  0xcd   : > { %s2151_s5 = scalar_lea.vmem %s2150_s23, 256  ;;  %p2152_p6 = scmp.lt.s32.totalorder %s359_s1, %s2150_s23 }
  0xce   : > { %p2147_p11 = pnand %p2145_p13, %p2836_p3  ;;  %p2153_p5 = scmp.lt.s32.totalorder %s2151_s5, %s2144_s10 }
  0xd0   : > { %p2148_p1 = pneg %p2147_p11  ;;  %p2154_p8 = por %p2153_p5, %p2152_p6 }
  0xd2   : > { %p2155_p2 = pnand %p2154_p8, %p2148_p1 }
  0xd4   : > { %2158 = shalt.err (!%p2155_p2)
}
  0xd5   : > { %p2838_p4 = scmp.ne.s32.totalorder %s2828_s9, 0  ;;  %p2839_p10 = scmp.ne.s32.totalorder %s2816_s12, 0 }
  0xd6   : > { %s2586_s17 = sand.u32 (!%p2839_p10), 1, %s2229_s28   ;;  %p2840_p3 = scmp.ne.s32.totalorder (!%p2839_p10), %s2823_s20, 0 }
  0xd7   : > { %1877 = dma.hbm_to_vmem [thread:$0]  (!%p2838_p4), %s2562_s16, 128, %s359_s1, %s2459_s19  }
  0xd8   : > { %367 = sbr.rel (%p2839_p10) target bundleno = 2452 (0x994), region = 52  ;;  %s2589_s8 = sshll.u32 (!%p2839_p10), %s2586_s17, 3 }
  0xd9   : > { %s370_s27 = scalar_lea.sflag (!%p2839_p10), [#allocation3], %s2586_s17  ;;  %s373_s21 = scalar_lea.vmem (!%p2839_p10), [#allocation2], %s2589_s8 }
  0xdf   : > { %2204 = dma.done.wait (%p2840_p3), %s370_s27, 128  }
  0xe0   : > { %2206 = vsyncadd (%p2840_p3), %s370_s27, 4294967168  ;;  %s378_s12 = sand.u32 1, %s2324_s11   ;;  %s382_s9 = scalar_lea.vmem [#allocation5], %s2589_s8 }
  0xe1   : > { %s379_s19 = scalar_lea.sflag [#allocation6], %s378_s12 }
  0xe2   : > { %2208 = dma.done.wait (%p2840_p3), %s379_s19, 256  }
  0xe3   : > { %2210 = vsyncadd (%p2840_p3), %s379_s19, 4294967040  ;;  %s391_s22 = scalar_lea.vmem [#allocation7], %s2589_s8  ;;  %p2841_p8 = scmp.eq.s32.totalorder %s2324_s11, 0 }
  0xe5   : > { %2212 = dma.done.wait (%p2841_p8), [#allocation9], 1024   ;;  %p2842_p12 = pmov %p2841_p8 }
  0xe6   : > { %p2843_p0 = pmov %p2841_p8 }
  0xe7   : > { %2214 = vsyncadd (%p2842_p12), [#allocation9], 4294966272 }
  0xe8   : > { %2216 = dma.done.wait (%p2843_p0), [#allocation12], 1024   ;;  %p2844_p7 = pmov %p2843_p0 }
  0xe9   : > { %v2248_v0 = vmov 0.0|0.0   ;;  %vm2249_vm0 = vmmov 0   ;;  %v2250_v1 = vmov 0.0   ;;  %v454_v2 = vld [vmem:[#allocation10] sm:$0xff]  ;;  %v455_v3 = vld [vmem:[#allocation10 + $0x8] sm:$0xff]  ;;  %v456_v7 = vld [vmem:[#allocation10 + $0x10] sm:$0xff]  ;;  %v470_v16 = vlaneseq }
  0xea   : > { %2218 = vsyncadd (%p2844_p7), [#allocation12], 4294966272  ;;  %1813 = vmatprep.subr.bf16.mxu1 %v2248_v0  ;;  %1807 = vmatprep.subr.bf16.mxu0 %v2248_v0  ;;  %v450_v4 = vld [vmem:[#allocation8] sm:$0xff]  ;;  %v1814_v5 = vpack.c.bf16 %v455_v3, %v454_v2  ;;  %v451_v6 = vld [vmem:[#allocation8 + $0x8] sm:$0xff]  ;;  %vm474_vm1 = vcmask 261120   ;;  %vm703_vm2 = vcmask 64512  }
  0xeb   : > { %1742 = vmatprep.mubr.msk.f32.mxu1 %vm2249_vm0, %v2250_v1  ;;  %1731 = vmatprep.mubr.msk.f32.mxu0 %vm2249_vm0, %v2250_v1  ;;  %v457_v8 = vld [vmem:[#allocation10 + $0x18] sm:$0xff]  ;;  %v1808_v9 = vpack.c.bf16 %v451_v6, %v450_v4  ;;  %v452_v10 = vld [vmem:[#allocation8 + $0x10] sm:$0xff]  ;;  %v468_v14 = vld [vmem:[%s382_s9] sm:$0xff]  ;;  %v2635_v17 = vshrl.u32 %v470_v16, 7  ;;  %s2251_s16 = smov 120   ;;  %s2252_s13 = smov 112  }
  0xec   : > { %v453_v11 = vld [vmem:[#allocation8 + $0x18] sm:$0xff]  ;;  %1815 = vmatpush3.bf16.msra.mxu1 %v1814_v5  ;;  %v1817_v12 = vpack.c.bf16 %v457_v8, %v456_v7  ;;  %v2641_v19 = vld [vmem:[%s2783_s7] sm:$0x3f]  ;;  %s2253_s1 = smov 104   ;;  %v458_v30 = vld [vmem:[#allocation11] sm:$0xff]  ;;  %s2254_s25 = smov 8  }
  0xed   : > { %1809 = vmatpush3.bf16.msra.mxu0 %v1808_v9  ;;  %1816 = vmatprep.subr.bf16.mxu1 %v2248_v0  ;;  %v1811_v13 = vpack.c.bf16 %v453_v11, %v452_v10  ;;  %v2624_v15 = vld [vmem:[%s373_s21] sm:$0xff]  ;;  %v551_v18 = vsub.s32 1, %v2635_v17  ;;  %v472_v20 = vsub.s32 0, %v2635_v17  ;;  %v459_v31 = vld [vmem:[#allocation11 + $0x8] sm:$0xff]  ;;  %v628_v45 = vsub.s32 2, %v2635_v17  ;;  %s2255_s3 = smov 16  }
  0xee   : > { %1810 = vmatprep.subr.bf16.mxu0 %v2248_v0  ;;  %v460_v32 = vld [vmem:[#allocation11 + $0x10] sm:$0xff]  ;;  %v1820_v33 = vpack.c.bf16 %v459_v31, %v458_v30  ;;  %v461_v34 = vld [vmem:[#allocation11 + $0x18] sm:$0xff]  ;;  %s2256_s14 = smov 24   ;;  %vm1373_vm3 = vcmask 130048   ;;  %vm1375_vm4 = vcmask 195584   ;;  %s2845_s26 = sld [smem:[#allocation24_spill]] }
  0xef   : > { %v552_v21 = vrot.slane %v2641_v19, %v551_v18  ;;  %v473_v22 = vrot.slane %v2641_v19, %v472_v20  ;;  %v1823_v35 = vpack.c.bf16 %v461_v34, %v460_v32  ;;  %v469_v36 = vld [vmem:[%s391_s22] sm:$0xff]  ;;  %v629_v46 = vrot.slane %v2641_v19, %v628_v45  ;;  %s1684_s30 = sshll.u32 %s2324_s11, 7  ;;  %s449_s18 = scalar_lea.vmem [#allocation14], %s2589_s8 }
  0xf0   : > { %1818 = vmatpush3.bf16.msra.mxu1 %v1817_v12  ;;  %s1494_s10 = sshll.u32 %s449_s18, 4  ;;  %s2846_s5 = sld [smem:[#allocation29_spill]]  ;;  %s2733_s10 = int_to_ptr.vmem [resolvable:$true] %s1494_s10 }
  0xf1   : > { %1812 = vmatpush3.bf16.msra.mxu0 %v1811_v13  ;;  %1756 = vmatprep.subr.mxu1 %v2250_v1  ;;  %s1481_s21 = scalar_lea.sflag [#allocation4], %s2586_s17  ;;  %s2159_s12 = scalar_lea.vmem %s2733_s10, 128 }
  0xf2   : > { %1819 = vmatprep.subr.bf16.mxu0 %v2248_v0  ;;  %p2160_p9 = scmp.ne.s32.totalorder %s2733_s10, %s2159_s12  ;;  %s2257_s11 = smov [#allocation14]  }
  0xf3   : > { %1743 = vmatmul.mubr.msk.f32.vlgmr.msra.gmra.mrb[0].mxu1 %vm474_vm1, %v468_v14  ;;  %s2163_s8 = sshll.u32 %s2257_s11, 4  ;;  %s2164_s8 = int_to_ptr.vmem [resolvable:$false] %s2163_s8 }
  0xf4   : > { %1732 = vmatmul.mubr.msk.f32.vlgmr.msra.gmra.mrb[0].mxu0 %vm474_vm1, %v2624_v15  ;;  %1758 = vmatprep.mubr.msk.f32.mxu1 %vm2249_vm0, %v2250_v1  ;;  %p2847_p13 = scmp.ne.s32.totalorder %s2845_s26, 0  ;;  %s2165_s19 = scalar_lea.vmem %s2164_s8, 256 }
  0xf5   : > { %1753 = vmatprep.mubr.msk.f32.mxu0 %vm2249_vm0, %v2250_v1  ;;  %1821 = vmatpush3.bf16.msra.mxu0 %v1820_v33  ;;  %p2166_p6 = scmp.lt.s32.totalorder %s2733_s10, %s2164_s8  ;;  %p2167_p5 = scmp.lt.s32.totalorder %s2165_s19, %s2159_s12 }
  0xf6   : > { %1822 = vmatprep.subr.bf16.mxu0 %v2248_v0  ;;  %s2731_s27 = scalar_lea.hbm %s2846_s5, %s1684_s30  ;;  %p2161_p11 = pnand %p2160_p9, %p2847_p13 }
  0xf7   : > { %p2168_p2 = por %p2167_p5, %p2166_p6 }
  0xf8   : > { %p2162_p1 = pneg %p2161_p11 }
  0xf9   : > { %1824 = vmatpush3.bf16.msra.mxu0 %v1823_v35 }
  0xfa   : > { %1776 = vmatprep.subr.mxu0 %v2250_v1  ;;  %p2169_p4 = pnand %p2168_p2, %p2162_p1 }
  0xfc   : > { %1754 = vmatmul.mubr.msk.f32.vlgmr.msra.gmra.mrb[2].mxu0 %vm474_vm1, %v469_v36 }
  0xfd   : > { %1778 = vmatprep.mubr.msk.f32.mxu0 %vm2249_vm0, %v2250_v1 }
 0x1c6   : > { %v622_v23 = vpop.f32.mrb[0].mxu1 }
 0x1c7   : > { %v623_v24 = vadd.f32 %v622_v23, %v552_v21  ;;  %v544_v25 = vpop.f32.mrb[0].mxu0  ;;  %v1744_v26 = vpop.f32.mrb[1].mxu1 }
 0x1c8   : > { %v545_v27 = vadd.f32 %v544_v25, %v473_v22  ;;  %v1733_v28 = vpop.f32.mrb[1].mxu0 }
 0x1c9   : > { %866 = vrot.lane.b32.xlu1 %v623_v24, %s2251_s16  ;;  %1757 = vmatpush3.xpose.msk.msra.mxu1 %vm703_vm2, %v623_v24 }
 0x1ca   : > { %v548_v29 = vmul.f32 0.35355338, %v545_v27  ;;  %1761 = vmatprep.subr.mxu1 %v2250_v1 }
 0x1cc   : > { %1759 = vmatmul.mubr.msk.f32.vlgmr.msra.gmra.mrb[2].mxu1 %vm703_vm2, %v548_v29 }
 0x1cd   : > { %864 = vrot.lane.b32.xlu1 %v548_v29, %s2251_s16  ;;  %1763 = vmatprep.mubr.msk.f32.mxu1 %vm2249_vm0, %v2250_v1 }
 0x1cf   : > { %v699_v47 = vpop.f32.mrb[2].mxu0 }
 0x1d0   : > { %v2667_v48 = vadd.f32 %v699_v47, %v629_v46  ;;  %v1755_v49 = vpop.f32.mrb[3].mxu0 }
 0x1d1   : > { %1030 = vrot.lane.b32.xlu1 %v548_v29, %s2252_s13 }
 0x1d2   : > { %1762 = vmatpush3.msra.mxu1 %v2667_v48 }
 0x1d3   : > { %1766 = vmatprep.subr.mxu1 %v2250_v1 }
 0x1d5   : > { %1197 = vrot.lane.b32.xlu1 %v623_v24, %s2253_s1 }
 0x1d9   : > { %1195 = vrot.lane.b32.xlu1 %v548_v29, %s2253_s1 }
 0x23b   : > { %v867_v50 = vpop.permute.xlu1 %866 }
 0x23f   : > { %v865_v51 = vpop.permute.xlu1 %864 }
 0x243   : > { %v1031_v52 = vpop.permute.xlu1 %1030 }
 0x247   : > { %v1198_v55 = vpop.permute.xlu1 %1197 }
 0x24b   : > { %v1196_v57 = vpop.permute.xlu1 %1195 }
 0x29f   : > { %v776_v37 = vpop.f32.mrb[2].mxu1 }
 0x2a0   : > { %v1760_v38 = vpop.f32.mrb[3].mxu1  ;;  %v780_v39 = vsel %vm703_vm2, %v776_v37, -inf }
 0x2a1   : > { %781 = vmax.xlane.f32.xlu0 %v780_v39  ;;  %v462_v38 = vld [vmem:[#allocation13] sm:$0xff]  ;;  %v463_v39 = vld [vmem:[#allocation13 + $0x8] sm:$0xff] }
 0x32e   : > { %v782_v40 = vpop.xlane.xlu0 %781 }
 0x32f   : > { %v783_v41 = vsub.f32 %v776_v37, %v782_v40  ;;  %v1826_v40 = vpack.c.bf16 %v463_v39, %v462_v38 }
 0x331   : > { %v784_v42 = vmul.f32 1.442695, %v783_v41  ;;  %v464_v41 = vld [vmem:[#allocation13 + $0x10] sm:$0xff] }
 0x333   : > { %1939 = vpow2.f32 %v784_v42  ;;  %v465_v42 = vld [vmem:[#allocation13 + $0x18] sm:$0xff] }
 0x33d   : > { %v1940_v43 = vpop.eup %1939 }
 0x33e   : > { %v786_v44 = vsel %vm703_vm2, %v1940_v43, 0.0 }
 0x33f   : > { %787 = vadd.xlane.f32.xlu0 %v786_v44 }
 0x355   : > { %1032 = vrot.lane.b32.xlu0 %v623_v24, %s2252_s13 }
 0x3cc   : > { %v788_v53 = vpop.xlane.xlu0 %787 }
 0x3cd   : > { %1941 = vrcp.f32 %v788_v53 }
 0x3d0   : > { %v1033_v54 = vpop.permute.xlu0 %1032 }
 0x3d1   : > { %1777 = vmatpush3.xpose.msk.msra.mxu0 %vm703_vm2, %v1033_v54  ;;  %v1379_v54 = vsub.s32 3, %v2635_v17 }
 0x3d2   : > { %1786 = vmatprep.subr.mxu0 %v2250_v1 }
 0x3d4   : > { %1779 = vmatmul.mubr.msk.f32.vlgmr.msra.gmra.mrb[4].mxu0 %vm703_vm2, %v1031_v52 }
 0x3d5   : > { %1787 = vmatpush3.xpose.msk.msra.mxu0 %vm703_vm2, %v1198_v55  ;;  %1788 = vmatprep.mubr.msk.f32.mxu0 %vm2249_vm0, %v2250_v1  ;;  %v1380_v55 = vrot.slane %v2641_v19, %v1379_v54 }
 0x3d6   : > { %1825 = vmatprep.subr.bf16.mxu0 %v2248_v0 }
 0x3d7   : > { %v1942_v56 = vpop.eup %1941 }
 0x3d8   : > { %v790_v58 = vmul.f32 %v1942_v56, %v1940_v43  ;;  %1789 = vmatmul.mubr.msk.f32.vlgmr.msra.gmra.mrb[6].mxu0 %vm703_vm2, %v1196_v57  ;;  %v1829_v43 = vpack.c.bf16 %v465_v42, %v464_v41 }
 0x3d9   : > { %1804 = vmatprep.mubr.msk.f32.mxu0 %vm2249_vm0, %v2250_v1  ;;  %1827 = vmatpush3.bf16.msra.mxu0 %v1826_v40 }
 0x3da   : > { %1764 = vmatmul.mubr.msk.f32.vlgmr.msra.gmra.mrb[4].mxu1 %vm703_vm2, %v790_v58  ;;  %1828 = vmatprep.subr.bf16.mxu0 %v2248_v0 }
 0x3db   : > { %1767 = vmatpush3.xpose.msk.msra.mxu1 %vm703_vm2, %v867_v50  ;;  %1768 = vmatprep.mubr.msk.f32.mxu1 %vm2249_vm0, %v2250_v1 }
 0x3dc   : > { %1771 = vmatprep.subr.mxu1 %v2250_v1 }
 0x3dd   : > { %1830 = vmatpush3.bf16.msra.mxu0 %v1829_v43 }
 0x3de   : > { %1769 = vmatmul.mubr.msk.f32.vlgmr.msra.gmra.mrb[6].mxu1 %vm703_vm2, %v865_v51 }
 0x3df   : > { %1773 = vmatprep.mubr.msk.f32.mxu1 %vm2249_vm0, %v2250_v1 }
 0x4a7   : > { %v1104_v59 = vpop.f32.mrb[4].mxu0 }
 0x4a8   : > { %v1780_v60 = vpop.f32.mrb[5].mxu0  ;;  %v1108_v61 = vsel %vm703_vm2, %v1104_v59, -inf }
 0x4a9   : > { %1109 = vmax.xlane.f32.xlu0 %v1108_v61 }
 0x4ab   : > { %v1269_v62 = vpop.f32.mrb[6].mxu0 }
 0x4ac   : > { %v1790_v63 = vpop.f32.mrb[7].mxu0  ;;  %v1273_v7 = vsel %vm703_vm2, %v1269_v62, -inf }
 0x4ad   : > { %v2691_v2 = vpop.f32.mrb[4].mxu1 }
 0x4ae   : > { %v1765_v3 = vpop.f32.mrb[5].mxu1 }
 0x4b1   : > { %v938_v4 = vpop.f32.mrb[6].mxu1 }
 0x4b2   : > { %v1770_v5 = vpop.f32.mrb[7].mxu1  ;;  %v942_v6 = vsel %vm703_vm2, %v938_v4, -inf }
 0x4b3   : > { %943 = vmax.xlane.f32.xlu1 %v942_v6 }
 0x4b7   : > { %1274 = vmax.xlane.f32.xlu1 %v1273_v7  ;;  %v1471_v7 = vsub.s32 4, %v2635_v17 }
 0x536   : > { %v1110_v8 = vpop.xlane.xlu0 %1109 }
 0x537   : > { %v1111_v9 = vsub.f32 %v1104_v59, %v1110_v8  ;;  %v1472_v8 = vrot.slane %v2641_v19, %v1471_v7 }
 0x539   : > { %v1112_v10 = vmul.f32 1.442695, %v1111_v9 }
 0x53b   : > { %1943 = vpow2.f32 %v1112_v10 }
 0x540   : > { %v944_v11 = vpop.xlane.xlu1 %943 }
 0x541   : > { %v945_v22 = vsub.f32 %v938_v4, %v944_v11 }
 0x543   : > { %v946_v23 = vmul.f32 1.442695, %v945_v22 }
 0x544   : > { %v1275_v12 = vpop.xlane.xlu1 %1274 }
 0x545   : > { %v1944_v13 = vpop.eup %1943  ;;  %v1276_v14 = vsub.f32 %v1269_v62, %v1275_v12 }
 0x546   : > { %v1114_v16 = vsel %vm703_vm2, %v1944_v13, 0.0 }
 0x547   : > { %v1277_v18 = vmul.f32 1.442695, %v1276_v14  ;;  %1115 = vadd.xlane.f32.xlu0 %v1114_v16 }
 0x549   : > { %1945 = vpow2.f32 %v1277_v18 }
 0x54a   : > { %1947 = vpow2.f32 %v946_v23 }
 0x553   : > { %v1946_v20 = vpop.eup %1945 }
 0x554   : > { %v1279_v21 = vsel %vm703_vm2, %v1946_v20, 0.0  ;;  %v1948_v24 = vpop.eup %1947 }
 0x555   : > { %1280 = vadd.xlane.f32.xlu1 %v1279_v21  ;;  %v948_v25 = vsel %vm703_vm2, %v1948_v24, 0.0 }
 0x55d   : > { %954 = vrot.lane.b32.xlu0 %v2667_v48, %s2251_s16 }
 0x566   : > { %1119 = vrot.lane.b32.xlu1 %v2667_v48, %s2252_s13 }
 0x58a   : > { %949 = vadd.xlane.f32.xlu1 %v948_v25 }
 0x59b   : > { %1284 = vrot.lane.b32.xlu1 %v2667_v48, %s2253_s1 }
 0x5d4   : > { %v1116_v26 = vpop.xlane.xlu0 %1115 }
 0x5d8   : > { %v955_v27 = vpop.permute.xlu0 %954 }
 0x5d9   : > { %1772 = vmatpush3.msra.mxu1 %v955_v27 }
 0x5da   : > { %1781 = vmatprep.subr.mxu1 %v2250_v1 }
 0x5e2   : > { %v1281_v28 = vpop.xlane.xlu1 %1280 }
 0x5e6   : > { %v1120_v29 = vpop.permute.xlu1 %1119 }
 0x617   : > { %v950_v30 = vpop.xlane.xlu1 %949 }
 0x618   : > { %1949 = vrcp.f32 %v950_v30 }
 0x619   : > { %1951 = vrcp.f32 %v1116_v26 }
 0x61a   : > { %1953 = vrcp.f32 %v1281_v28 }
 0x61b   : > { %v1285_v36 = vpop.permute.xlu1 %1284 }
 0x622   : > { %v1950_v31 = vpop.eup %1949 }
 0x623   : > { %v952_v32 = vmul.f32 %v1950_v31, %v1948_v24  ;;  %v1952_v33 = vpop.eup %1951 }
 0x624   : > { %v1118_v34 = vmul.f32 %v1952_v33, %v1944_v13  ;;  %v1954_v35 = vpop.eup %1953 }
 0x625   : > { %1774 = vmatmul.mubr.msk.f32.vlgmr.msra.gmra.mrb[8].mxu1 %vm703_vm2, %v952_v32  ;;  %v1283_v37 = vmul.f32 %v1954_v35, %v1946_v20 }
 0x626   : > { %1782 = vmatpush3.msra.mxu1 %v1120_v29  ;;  %1783 = vmatprep.mubr.msk.f32.mxu1 %vm2249_vm0, %v2250_v1 }
 0x627   : > { %1791 = vmatprep.subr.mxu1 %v2250_v1 }
 0x629   : > { %1784 = vmatmul.mubr.msk.f32.vlgmr.msra.gmra.mrb[10].mxu1 %vm703_vm2, %v1118_v34 }
 0x62a   : > { %1792 = vmatpush3.msra.mxu1 %v1285_v36  ;;  %1793 = vmatprep.mubr.msk.f32.mxu1 %vm2249_vm0, %v2250_v1 }
 0x62d   : > { %1794 = vmatmul.mubr.msk.f32.vlgmr.msra.gmra.mrb[12].mxu1 %vm703_vm2, %v1283_v37 }
 0x6f8   : > { %v1026_v44 = vpop.f32.mrb[8].mxu1 }
 0x6f9   : > { %1361 = vrot.lane.b32.xlu0 %v1026_v44, %s2254_s25  ;;  %v1775_v45 = vpop.f32.mrb[9].mxu1 }
 0x6fc   : > { %v1191_v46 = vpop.f32.mrb[10].mxu1 }
 0x6fd   : > { %1365 = vrot.lane.b32.xlu1 %v1191_v46, %s2255_s3  ;;  %v1785_v1 = vpop.f32.mrb[11].mxu1 }
 0x700   : > { %v1356_v47 = vpop.f32.mrb[12].mxu1 }
 0x701   : > { %1369 = vrot.lane.b32.xlu0 %v1356_v47, %s2256_s14  ;;  %v1795_v48 = vpop.f32.mrb[13].mxu1 }
 0x76b   : > { %v1362_v49 = vpop.permute.xlu0 %1361 }
 0x76c   : > { %v1372_v0 = vsel %vm703_vm2, %v2691_v2, %v1362_v49 }
 0x76f   : > { %v1366_v50 = vpop.permute.xlu1 %1365 }
 0x770   : > { %v1374_v51 = vsel %vm1373_vm3, %v1372_v0, %v1366_v50 }
 0x773   : > { %v1370_v52 = vpop.permute.xlu0 %1369 }
 0x774   : > { %v1376_v53 = vsel %vm1375_vm4, %v1374_v51, %v1370_v52 }
 0x775   : > { %1805 = vmatmul.mubr.msk.f32.vlgmr.msra.gmra.mrb[8].mxu0 %vm474_vm1, %v1376_v53 }
 0x848   : > { %v1450_v56 = vpop.f32.mrb[8].mxu0 }
 0x849   : > { %v1451_v57 = vadd.f32 %v1450_v56, %v1380_v55  ;;  %v1806_v58 = vpop.f32.mrb[9].mxu0 }
 0x84b   : > { %v1454_v59 = vadd.f32 %v1451_v57, %v2624_v15  ;;  %v1476_v15 = vsub.s32 5, %v2635_v17 }
 0x84d   : > { %v1455_v60 = vsel %vm474_vm1, %v1454_v59, 0.0  ;;  %v1477_v11 = vrot.slane %v2641_v19, %v1476_v15 }
 0x84e   : > { %1456 = vadd.xlane.f32.xlu1 %v1455_v60 }
 0x8db   : > { %v1457_v61 = vpop.xlane.xlu1 %1456 }
 0x8dc   : > { %v1459_v62 = vmul.f32 0.03125, %v1457_v61 }
 0x8de   : > { %v1460_v63 = vsub.f32 %v1454_v59, %v1459_v62 }
 0x8e0   : > { %v1461_v2 = vmul.f32 %v1460_v63, %v1460_v63 }
 0x8e2   : > { %v1462_v3 = vsel %vm474_vm1, %v1461_v2, 0.0 }
 0x8e3   : > { %1463 = vadd.xlane.f32.xlu0 %v1462_v3 }
 0x970   : > { %v1464_v4 = vpop.xlane.xlu0 %1463 }
 0x971   : > { %v1465_v5 = vmul.f32 0.03125, %v1464_v4 }
 0x973   : > { %v1466_v6 = vadd.f32 1e-05, %v1465_v5 }
 0x975   : > { %1955 = vrsqrt.f32 %v1466_v6 }
 0x97f   : > { %v1956_v9 = vpop.eup %1955 }
 0x980   : > { %v1468_v10 = vmul.f32 %v1956_v9, %v1460_v63 }
 0x982   : > { %v1473_v12 = vmul.f32 %v1472_v8, %v1468_v10 }
 0x984   : > { %v1478_v13 = vadd.f32 %v1477_v11, %v1473_v12 }
 0x986   : > { %1479 = vst.msk [vmem:[%s449_s18] sm:$0xff] %vm474_vm1, %v1478_v13 }
 0x987   : > { %2172 = shalt.err (!%p2169_p4)
}
 0x988   : > { %s2173_s17 = scalar_lea.hbm %s2731_s27, 128  ;;  %s2177_s20 = scalar_lea.hbm %s2846_s5, 256 }
 0x989   : > { %p2174_p10 = scmp.ne.s32.totalorder %s2731_s27, %s2173_s17  ;;  %p2178_p12 = scmp.lt.u32.totalorder %s2731_s27, %s2846_s5 }
 0x98a   : > { %p2179_p0 = scmp.lt.u32.totalorder %s2177_s20, %s2173_s17  ;;  %p2181_p9 = scmp.lt.u32.totalorder %s2173_s17, %s2731_s27 }
 0x98b   : > { %p2175_p3 = pnand %p2174_p10, %p2847_p13 }
 0x98c   : > { %p2180_p7 = por %p2179_p0, %p2178_p12 }
 0x98d   : > { %p2176_p8 = pneg %p2175_p3 }
 0x98e   : > { %p2182_p11 = por %p2181_p9, %p2180_p7 }
 0x990   : > { %p2183_p1 = pnand %p2182_p11, %p2176_p8 }
 0x992   : > { %2186 = shalt.err (!%p2183_p1)
}
 0x993   : > { %1853 = dma.vmem_to_hbm [thread:$0]  (%p2847_p13), %s2733_s10, 128, %s2731_s27, %s1481_s21  }
 0x994 PF: > { %s2848_s13 = sld [smem:[#allocation20_spill]]  ;;  %s2849_s1 = sld [smem:[#allocation25_spill]] }
 0x995   : > { %s2850_s25 = sld [smem:[#allocation21_spill]] }
 0x99a   : > { %s1506_s3 = sand.u32 1, %s2848_s13   ;;  %p2851_p6 = scmp.ne.s32.totalorder %s2849_s1, 0 }
 0x99b   : > { %p2852_p5 = scmp.ge.s32.totalorder %s2850_s25, 2  ;;  %s1507_s14 = scalar_lea.sflag [#allocation4], %s1506_s3 }
 0x99d   : > { %p1879_p2 = pnand %p2852_p5, %p2851_p6 }
 0x99f   : > { %2220 = dma.done.wait (!%p1879_p2), %s1507_s14, 128  }
 0x9a0   : > { %2222 = vsyncadd (!%p1879_p2), %s1507_s14, 4294967168  ;;  %s2853_s30 = sld [smem:[#allocation22_spill]]  ;;  %s2854_s18 = sld [smem:[#allocation23_spill]] }
 0x9a1   : > { %s2855_s27 = smov %s2229_s28  ;;  %s2856_s28 = smov %s2233_s29 }
 0x9a6   : > { %p26_p4 = scmp.ge.s32.totalorder %s2853_s30, 4   ;;  %s2857_s29 = smov %s2854_s18 }
 0x9a8   :  { %28 = sbr.rel (!%p26_p4) target bundleno = 14 (0xe), region = 137 }
 0x9af   :  { %1512 = vsyncpa [#allocation3], 1 }
 0x9b0   :  { %1514 = vsyncpa [#allocation3 + $0x1], 1 }
 0x9b1   :  { %1515 = vsyncpa [#allocation6], 1 }
 0x9b2   :  { %1517 = vsyncpa [#allocation6 + $0x1], 1 }
 0x9b3   :  { %1518 = vsyncpa [#allocation9], 1 }
 0x9b4   :  { %1519 = vsyncpa [#allocation12], 1 }
 0x9b5   :  { %1520 = vsyncpa [#allocation4], 1 }
 0x9b6   :  { %1522 = vsyncpa [#allocation4 + $0x1], 1 }

</bundles_post_ra>
